<compile_context>
chip_gen: v5e
topology: v5e:2x2
jax: 0.10.0
libtpu: 0.0.40
codegen_flags: <defaults>
</compile_context>

<pallas_src>
import jax
import jax.numpy as jnp
from jax.experimental import pallas as pl
from jax.experimental.pallas import tpu as pltpu

VOCAB = 16     # input_size (vocabulary)
HIDDEN = 32    # hidden_size (small for the test; module default is 256)


def encoder_gru_kernel(tok_ref, emb_ref, h_ref, w_ref, b_ref, out_ref):
    """Fused embedding-lookup + single GRU step.

    tok_ref : SMEM (1,)  int32   token id
    emb_ref : VMEM (V, H)        embedding table
    h_ref   : VMEM (1, H)        previous hidden state
    w_ref   : VMEM (2H, 4H)      fused gate weights  [x-rows ; h-rows]
    b_ref   : VMEM (1, 4H)       fused gate biases   [r | z | n_in | n_h]
    out_ref : VMEM (1, H)        new hidden state (== GRU output)
    """
    H = h_ref.shape[-1]
    tok = tok_ref[0]

    x = emb_ref[pl.ds(tok, 1), :].astype(jnp.float32)      # (1, H) embedded token
    h = h_ref[...].astype(jnp.float32)                     # (1, H) previous hidden

    xh = jnp.concatenate([x, h], axis=-1)                  # (1, 2H)
    # Single MXU pass: (1, 2H) @ (2H, 4H) -> (1, 4H) lane-dense gate slab.
    g = jnp.dot(xh, w_ref[...], preferred_element_type=jnp.float32) + b_ref[...]

    r = jax.nn.sigmoid(g[:, 0:H])
    z = jax.nn.sigmoid(g[:, H:2 * H])
    n = jnp.tanh(g[:, 2 * H:3 * H] + r * g[:, 3 * H:4 * H])
    h_new = (1.0 - z) * n + z * h

    out_ref[...] = h_new.astype(out_ref.dtype)


def init_encoder_params(key, input_size=VOCAB, hidden_size=HIDDEN):
    """Deterministic synthetic parameters matching nn.Embedding + nn.GRU shapes."""
    keys = jax.random.split(key, 5)
    k = 1.0 / jnp.sqrt(hidden_size)
    return {
        # nn.Embedding(input_size, hidden_size): N(0, 1) init.
        "embedding": jax.random.normal(keys[0], (input_size, hidden_size), jnp.float32),
        # nn.GRU(hidden_size, hidden_size): concatenated [r | z | n] slabs.
        "weight_ih": jax.random.uniform(keys[1], (3 * hidden_size, hidden_size),
                                        jnp.float32, -k, k),
        "weight_hh": jax.random.uniform(keys[2], (3 * hidden_size, hidden_size),
                                        jnp.float32, -k, k),
        "bias_ih": jax.random.uniform(keys[3], (3 * hidden_size,), jnp.float32, -k, k),
        "bias_hh": jax.random.uniform(keys[4], (3 * hidden_size,), jnp.float32, -k, k),
    }


def pack_encoder_params(params, hidden_size=HIDDEN):
    """One-time packing (hoisted out of the per-step path).

    Returns (embedding (V,H), w_fused (2H,4H), b_fused (1,4H)).
    """
    H = hidden_size
    w_ih, w_hh = params["weight_ih"], params["weight_hh"]    # (3H, H) each
    b_ih, b_hh = params["bias_ih"], params["bias_hh"]        # (3H,)  each

    w_ir, w_iz, w_in = w_ih[0:H], w_ih[H:2 * H], w_ih[2 * H:3 * H]
    w_hr, w_hz, w_hn = w_hh[0:H], w_hh[H:2 * H], w_hh[2 * H:3 * H]
    zeros = jnp.zeros((H, H), jnp.float32)

    # Rows 0:H act on x, rows H:2H act on h; output columns are [r|z|n_in|n_h].
    top = jnp.concatenate([w_ir.T, w_iz.T, w_in.T, zeros], axis=1)    # (H, 4H)
    bot = jnp.concatenate([w_hr.T, w_hz.T, zeros, w_hn.T], axis=1)    # (H, 4H)
    w_fused = jnp.concatenate([top, bot], axis=0).astype(jnp.float32)  # (2H, 4H)

    b_fused = jnp.concatenate([
        b_ih[0:H] + b_hh[0:H],            # r bias (pre-summed)
        b_ih[H:2 * H] + b_hh[H:2 * H],    # z bias (pre-summed)
        b_ih[2 * H:3 * H],                # n input-path bias
        b_hh[2 * H:3 * H],                # n hidden-path bias (kept separate for r*)
    ]).reshape(1, 4 * H).astype(jnp.float32)

    return params["embedding"].astype(jnp.float32), w_fused, b_fused


@jax.jit
def encoder_rnn_forward(token, hidden, emb, w_fused, b_fused):
    """Forward pass of EncoderRNN. token: scalar int32, hidden: (1,1,H)."""
    H = emb.shape[1]
    tok = jnp.reshape(token, (1,)).astype(jnp.int32)
    h = hidden.reshape(1, H).astype(jnp.float32)

    h_new = pl.pallas_call(
        encoder_gru_kernel,
        out_shape=jax.ShapeDtypeStruct((1, H), jnp.float32),
        in_specs=[
            pl.BlockSpec(memory_space=pltpu.MemorySpace.SMEM),   # token id
            pl.BlockSpec(memory_space=pltpu.MemorySpace.VMEM),   # embedding table
            pl.BlockSpec(memory_space=pltpu.MemorySpace.VMEM),   # hidden state
            pl.BlockSpec(memory_space=pltpu.MemorySpace.VMEM),   # fused weights
            pl.BlockSpec(memory_space=pltpu.MemorySpace.VMEM),   # fused biases
        ],
        out_specs=pl.BlockSpec(memory_space=pltpu.MemorySpace.VMEM),
    )(tok, emb, h, w_fused, b_fused)

    # Match PyTorch return shapes: output (seq=1, batch=1, H), hidden (1, 1, H).
    out3 = h_new.reshape(1, 1, H)
    return out3, out3


def encoder_rnn_reference(token, hidden, params):
    """Pure-JAX reference of the same forward (for correctness check)."""
    H = HIDDEN
    x = jnp.take(params["embedding"], token, axis=0).reshape(1, H)
    h = hidden.reshape(1, H)
    w_ih, w_hh = params["weight_ih"], params["weight_hh"]
    b_ih, b_hh = params["bias_ih"], params["bias_hh"]
    gi = x @ w_ih.T + b_ih
    gh = h @ w_hh.T + b_hh
    r = jax.nn.sigmoid(gi[:, :H] + gh[:, :H])
    z = jax.nn.sigmoid(gi[:, H:2 * H] + gh[:, H:2 * H])
    n = jnp.tanh(gi[:, 2 * H:] + r * gh[:, 2 * H:])
    h_new = (1.0 - z) * n + z * h
    return h_new.reshape(1, 1, H), h_new.reshape(1, 1, H)


if __name__ == "__main__":
    key = jax.random.PRNGKey(0)
    pkey, tkey = jax.random.split(key, 2)

    params = init_encoder_params(pkey)
    emb, w_fused, b_fused = pack_encoder_params(params)           # packed ONCE

    token = jax.random.randint(tkey, (), 0, VOCAB, dtype=jnp.int32)   # one token
    hidden0 = jnp.zeros((1, 1, HIDDEN), jnp.float32)                  # initHidden()

    out, hid = encoder_rnn_forward(token, hidden0, emb, w_fused, b_fused)
    out = jax.block_until_ready(out)
    hid = jax.block_until_ready(hid)

    out_ref, hid_ref = encoder_rnn_reference(token, hidden0, params)
    assert out.shape == (1, 1, HIDDEN) and hid.shape == (1, 1, HIDDEN)
    assert jnp.allclose(out, out_ref, atol=1e-5, rtol=1e-5)
    assert jnp.allclose(hid, hid_ref, atol=1e-5, rtol=1e-5)

    print("KERNEL_OK")
</pallas_src>

<mosaic_0001>
module attributes {stable_mosaic.version = 11 : i64} {
  func.func @encoder_gru_kernel(%arg0: memref<1xi32, #tpu.memory_space<smem>>, %arg1: memref<16x32xf32, #tpu.memory_space<vmem>>, %arg2: memref<1x32xf32, #tpu.memory_space<vmem>>, %arg3: memref<64x128xf32, #tpu.memory_space<vmem>>, %arg4: memref<1x128xf32, #tpu.memory_space<vmem>>, %arg5: memref<1x32xf32, #tpu.memory_space<vmem>>) attributes {dimension_semantics = [], scalar_prefetch = 0 : i64, scratch_operands = 0 : i64, tpu.core_type = #tpu.core_type<tc>} {
    %c0 = arith.constant 0 : index
    %0 = memref.load %arg0[%c0] : memref<1xi32, #tpu.memory_space<smem>>
    %1 = arith.index_cast %0 : i32 to index
    %c0_0 = arith.constant 0 : index
    %2 = vector.load %arg1[%1, %c0_0] : memref<16x32xf32, #tpu.memory_space<vmem>>, vector<1x32xf32>
    %c0_1 = arith.constant 0 : index
    %c0_2 = arith.constant 0 : index
    %3 = vector.load %arg2[%c0_1, %c0_2] : memref<1x32xf32, #tpu.memory_space<vmem>>, vector<1x32xf32>
    %4 = tpu.concatenate %2, %3 in 1 : vector<1x32xf32>, vector<1x32xf32> -> vector<1x64xf32>
    %c0_3 = arith.constant 0 : index
    %c0_4 = arith.constant 0 : index
    %5 = vector.load %arg3[%c0_3, %c0_4] : memref<64x128xf32, #tpu.memory_space<vmem>>, vector<64x128xf32>
    %cst = arith.constant dense<0.000000e+00> : vector<1x128xf32>
    %6 = tpu.matmul %4, %5, %cst {dimension_numbers = #tpu.dot_dimension_numbers<[1], [0], [0], [1], [0, 0, 1, 1], [], []>} : vector<1x64xf32>, vector<64x128xf32>, vector<1x128xf32> -> vector<1x128xf32>
    %c0_5 = arith.constant 0 : index
    %c0_6 = arith.constant 0 : index
    %7 = vector.load %arg4[%c0_5, %c0_6] : memref<1x128xf32, #tpu.memory_space<vmem>>, vector<1x128xf32>
    %8 = arith.addf %6, %7 : vector<1x128xf32>
    %9 = vector.extract_strided_slice %8 {offsets = [0, 0], sizes = [1, 32], strides = [1, 1]} : vector<1x128xf32> to vector<1x32xf32>
    %10 = arith.negf %9 : vector<1x32xf32>
    %11 = math.exp %10 : vector<1x32xf32>
    %cst_7 = arith.constant 1.000000e+00 : f32
    %12 = vector.broadcast %cst_7 : f32 to vector<1x32xf32>
    %13 = arith.addf %12, %11 : vector<1x32xf32>
    %14 = arith.divf %12, %13 : vector<1x32xf32>
    %15 = vector.extract_strided_slice %8 {offsets = [0, 32], sizes = [1, 32], strides = [1, 1]} : vector<1x128xf32> to vector<1x32xf32>
    %16 = arith.negf %15 : vector<1x32xf32>
    %17 = math.exp %16 : vector<1x32xf32>
    %cst_8 = arith.constant 1.000000e+00 : f32
    %18 = vector.broadcast %cst_8 : f32 to vector<1x32xf32>
    %19 = arith.addf %18, %17 : vector<1x32xf32>
    %20 = arith.divf %18, %19 : vector<1x32xf32>
    %21 = vector.extract_strided_slice %8 {offsets = [0, 64], sizes = [1, 32], strides = [1, 1]} : vector<1x128xf32> to vector<1x32xf32>
    %22 = vector.extract_strided_slice %8 {offsets = [0, 96], sizes = [1, 32], strides = [1, 1]} : vector<1x128xf32> to vector<1x32xf32>
    %23 = arith.mulf %14, %22 : vector<1x32xf32>
    %24 = arith.addf %21, %23 : vector<1x32xf32>
    %25 = math.tanh %24 : vector<1x32xf32>
    %cst_9 = arith.constant 1.000000e+00 : f32
    %26 = vector.broadcast %cst_9 : f32 to vector<1x32xf32>
    %27 = arith.subf %26, %20 : vector<1x32xf32>
    %28 = arith.mulf %27, %25 : vector<1x32xf32>
    %29 = arith.mulf %20, %3 : vector<1x32xf32>
    %30 = arith.addf %28, %29 : vector<1x32xf32>
    %c0_10 = arith.constant 0 : index
    %c0_11 = arith.constant 0 : index
    %31 = vector.load %arg5[%c0_10, %c0_11] : memref<1x32xf32, #tpu.memory_space<vmem>>, vector<1x32xf32>
    tpu.vector_store %arg5[%c0_10, %c0_11], %30 {strides = array<i32>} : memref<1x32xf32, #tpu.memory_space<vmem>>, vector<1x32xf32>,
    return
  }
}

</mosaic_0001>

<bundles_post_ra>
// kernel: encoder_rnn_forward.1
= control target key start
LH: loop header
LB: loop body
LE: loop exit
PB: predicated region body
PF: predicated region fallthrough
CT: control target
= control target key end

     0   :  { %11 = vsyncpa [#allocation4], 0  ;;  %s271_s0 = inlined_call_operand.<no memory space> [shape: s32[1], index: 0, kind: input, shape index: {}]   ;;  %s272_s1 = inlined_call_operand.hbm [shape: f32[16,32], index: 1, kind: input, shape index: {}]   ;;  %s273_s2 = inlined_call_operand.vmem [shape: f32[1,32], index: 2, kind: input, shape index: {}]   ;;  %s274_s3 = inlined_call_operand.hbm [shape: f32[64,128], index: 3, kind: input, shape index: {}]   ;;  %s275_s4 = inlined_call_operand.vmem [shape: f32[1,128], index: 4, kind: input, shape index: {}]   ;;  %s276_s5 = inlined_call_operand.vmem [shape: f32[1,32], index: 5, kind: output, shape index: {}]  }
   0x1   :  { %s19_s20 = sshll.u32 %s272_s1, 4  ;;  %s20_s20 = int_to_ptr.hbm [resolvable:$true] %s19_s20 }
   0x2   :  { %12 = vsyncpa [#allocation6], 0  ;;  %s216_s21 = smov [#allocation3]   ;;  %s34_s25 = sshll.u32 %s274_s3, 4  ;;  %s35_s25 = int_to_ptr.hbm [resolvable:$true] %s34_s25 }
   0x3   :  { %s21_s22 = sshll.u32 %s216_s21, 4  ;;  %s217_s26 = smov 128   ;;  %s22_s22 = int_to_ptr.vmem [resolvable:$true] %s21_s22 }
   0x4   :  { %s218_s27 = smov 8   ;;  %s219_s28 = smov [#allocation5]  }
   0x5   :  { %27 = dma.hbm_to_vmem [thread:$0]  %s20_s20, 256, %s22_s22, [#allocation4], %s217_s26, %s217_s26, %s218_s27  }
   0x6   :  { %s36_s29 = sshll.u32 %s219_s28, 4  ;;  %s37_s29 = int_to_ptr.vmem [resolvable:$true] %s36_s29 }
   0x7   :  { %42 = dma.hbm_to_vmem [thread:$0]  %s35_s25, 1024, %s37_s29, [#allocation6], %s217_s26, %s217_s26, %s218_s27  }
   0x8   :  { %212 = dma.done.wait [#allocation4], 256  }
   0x9   :  { %213 = vsyncadd [#allocation4], 4294967040 }
   0xa   :  { %214 = dma.done.wait [#allocation6], 1024  }
   0xb   :  { %215 = vsyncadd [#allocation6], 4294966272  ;;  %v157_v0 = vld [vmem:[%s273_s2] ss:$0 sm:$0xff]  ;;  %v71_v1 = vld [vmem:[#allocation5 + $0x38] sm:$0xff]  ;;  %s220_s3 = smov 32  }
   0xc   :  { %85 = vmatpush.msra.mxu0 %v71_v1  ;;  %v70_v2 = vld [vmem:[#allocation5 + $0x30] sm:$0xff]  ;;  %59 = vrot.lane.b32.xlu0 %v157_v0, %s220_s3  ;;  %v69_v3 = vld [vmem:[#allocation5 + $0x28] sm:$0xff]  ;;  %v68_v4 = vld [vmem:[#allocation5 + $0x20] sm:$0xff]  ;;  %s54_s7 = scalar_lea.vmem [#allocation3], %s271_s0  ;;  %vm62_vm0 = vcmask 261120   ;;  %vm73_vm1 = vcmask 523264  }
   0xd   :  { %v67_v5 = vld [vmem:[#allocation5 + $0x18] sm:$0xff]  ;;  %v66_v6 = vld [vmem:[#allocation5 + $0x10] sm:$0xff]  ;;  %v65_v7 = vld [vmem:[#allocation5 + $0x8] sm:$0xff]  ;;  %s221_s0 = smov 64   ;;  %vm139_vm6 = vcmask 253952  }
   0xe   :  { %86 = vmatpush.msra.mxu0 %v70_v2  ;;  %v64_v8 = vld [vmem:[#allocation5] sm:$0xff]  ;;  %v55_v9 = vld [vmem:[%s54_s7] sm:$0x1] }
   0xf   :  { %v72_v12 = vld [vmem:[%s275_s4] sm:$0x1]  ;;  %s222_s4 = smov 96  }
  0x10   :  { %87 = vmatpush.msra.mxu0 %v69_v3 }
  0x12   :  { %88 = vmatpush.msra.mxu0 %v68_v4 }
  0x14   :  { %89 = vmatpush.msra.mxu0 %v67_v5 }
  0x16   :  { %90 = vmatpush.msra.mxu0 %v66_v6 }
  0x18   :  { %91 = vmatpush.msra.mxu0 %v65_v7 }
  0x1a   :  { %92 = vmatpush.msra.mxu0 %v64_v8 }
  0x7e   :  { %v60_v10 = vpop.permute.xlu0 %59 }
  0x7f   :  { %v63_v11 = vsel %vm62_vm0, %v55_v9, %v60_v10 }
  0x80   :  { %148 = vmatmul.msk.f32.vlgmr.msra.gmra.mxu0 %vm73_vm1, %v63_v11 }
  0xfd   :  { %v94_v13 = vpop.f32.mrf.mxu0 }
  0xfe   :  { %v95_v14 = vadd.f32 %v94_v13, %v72_v12 }
 0x100   :  { %117 = vrot.lane.b32.xlu0 %v95_v14, %s220_s3  ;;  %v149_v15 = vmul.f32 -1.442695, %v95_v14 }
 0x102   :  { %158 = vpow2.f32 %v149_v15 }
 0x108   :  { %v159_v16 = vpop.eup %158 }
 0x109   :  { %v100_v17 = vadd.f32 1.0, %v159_v16 }
 0x10b   :  { %160 = vrcp.f32 %v100_v17  ;;  %v112_v23 = vand.u32 2147483648, %v100_v17  ;;  %vm106_vm3 = vweird.f32 %v100_v17  ;;  %v110_v24 = vand.u32 2147483647, %v100_v17 }
 0x10d   :  { %v113_v26 = vor.u32 1.1754944e-38, %v112_v23  ;;  %vm111_vm5 = vcmp.eq.f32.partialorder %v110_v24, 8.507059e+37 }
 0x111   :  { %v161_v18 = vpop.eup %160 }
 0x112   :  { %v102_v19 = vmul.f32 %v161_v18, %v100_v17  ;;  %vm107_vm2 = vweird.f32 %v161_v18 }
 0x113   :  { %vm108_vm4 = vmor %vm106_vm3, %vm107_vm2 }
 0x114   :  { %v103_v20 = vsub.f32 1.0, %v102_v19 }
 0x116   :  { %v104_v21 = vmul.f32 %v161_v18, %v103_v20 }
 0x118   :  { %v105_v22 = vadd.f32 %v161_v18, %v104_v21 }
 0x11a   :  { %v109_v25 = vsel %vm108_vm4, %v161_v18, %v105_v22 }
 0x11b   :  { %v114_v28 = vsel %vm111_vm5, %v113_v26, %v109_v25 }
 0x11c   :  { %v127_v33 = vsub.f32 1.0, %v114_v28  ;;  %v133_v36 = vmul.f32 %v114_v28, %v60_v10 }
 0x172   :  { %v118_v27 = vpop.permute.xlu0 %117 }
 0x173   :  { %v120_v29 = vmul.f32 %v118_v27, %v114_v28 }
 0x175   :  { %122 = vrot.lane.b32.xlu1 %v120_v29, %s221_s0 }
 0x1e7   :  { %v123_v30 = vpop.permute.xlu1 %122 }
 0x1e8   :  { %v125_v31 = vadd.f32 %v123_v30, %v95_v14 }
 0x1ea   :  { %162 = vtanh.f32 %v125_v31 }
 0x1f0   :  { %v163_v32 = vpop.eup %162 }
 0x1f1   :  { %129 = vrot.lane.b32.xlu1 %v163_v32, %s222_s4 }
 0x263   :  { %v130_v34 = vpop.permute.xlu1 %129 }
 0x264   :  { %v132_v35 = vmul.f32 %v130_v34, %v127_v33 }
 0x266   :  { %v134_v37 = vadd.f32 %v133_v36, %v132_v35 }
 0x268   :  { %136 = vrot.lane.b32.xlu2 %v134_v37, %s222_s4 }
 0x2c2   :  { %v137_v38 = vpop.permute.xlu2 %136 }
 0x2c3   :  { %140 = vst.msk [vmem:[%s276_s5] sm:$0x1] %vm139_vm6, %v137_v38 }
 0x2c4   :  { %145 = vsyncpa [#allocation4], 1 }
 0x2c5   :  { %146 = vsyncpa [#allocation6], 1 }

</bundles_post_ra>
